<compile_context>
chip_gen: v7x
topology: tpu7x:2x2x1
jax: 0.10.0
libtpu: 0.0.40
codegen_flags: <defaults>
</compile_context>

<pallas_src>
import functools

import jax
import jax.numpy as jnp
from jax.experimental import pallas as pl
from jax.experimental.pallas import tpu as pltpu

LANE = 128
SUBLANE = 8


def _round_up(x, m):
    return ((x + m - 1) // m) * m


def _pad2(a, rows, cols):
    return jnp.pad(a, ((0, rows - a.shape[0]), (0, cols - a.shape[1])))


def _tanh_log_f32(z):
    # tanh(z) * log(tanh(z) * z + 1); t*z >= 0 so the log1p argument is >= 0.
    t = jnp.tanh(z)
    return t * jnp.log1p(t * z)


def _vmem_capacity_bytes():
    try:
        return int(pltpu.get_tpu_info().vmem_capacity_bytes)
    except Exception:
        return 64 << 20  # conservative (v7x per-TensorCore VMEM)


_VMEM_CAP = _vmem_capacity_bytes()
_HAS_BUFFERED = hasattr(pl, "Buffered")


def _const_spec(shape):
    """BlockSpec for weights/biases resident across all batch tiles (constant index_map).
    Single-buffered: the data is DMA'd once, so a second buffer is pure VMEM waste."""
    if _HAS_BUFFERED:
        return pl.BlockSpec(shape, lambda i: (0, 0), pipeline_mode=pl.Buffered(1))
    return pl.BlockSpec(shape, lambda i: (0, 0))


def _make_kernel(mxu_dtype):
    def kernel(x_ref,
               w1_ref, b1_ref,
               w2_ref, b2_ref,
               w3_ref, b3_ref,
               w4_ref, b4_ref,
               w5_ref,
               o_ref):
        # MXU inputs in mxu_dtype (bf16 or f32); accumulation + element-wise in f32.
        h = x_ref[...].astype(mxu_dtype)
        for w_ref, b_ref in ((w1_ref, b1_ref), (w2_ref, b2_ref),
                             (w3_ref, b3_ref), (w4_ref, b4_ref)):
            z = jnp.dot(h, w_ref[...], preferred_element_type=jnp.float32) + b_ref[...]
            h = _tanh_log_f32(z).astype(mxu_dtype)
        o_ref[...] = jnp.dot(h, w5_ref[...],
                             preferred_element_type=jnp.float32).astype(o_ref.dtype)
    return kernel


def prepare_params(params, mxu_dtype=jnp.bfloat16):
    """Pad to lane-dense (multiple-of-128) feature dims and cast ONCE, outside the
    per-call path. params: w1..w5 stored [in, out], b1..b4 stored [1, hidden]."""
    in_dim, hid = params["w1"].shape
    out_dim = params["w5"].shape[1]
    in_p = _round_up(in_dim, LANE)
    hid_p = _round_up(hid, LANE)
    out_p = _round_up(out_dim, LANE)
    wp = dict(
        w1=_pad2(params["w1"], in_p, hid_p).astype(mxu_dtype),
        w2=_pad2(params["w2"], hid_p, hid_p).astype(mxu_dtype),
        w3=_pad2(params["w3"], hid_p, hid_p).astype(mxu_dtype),
        w4=_pad2(params["w4"], hid_p, hid_p).astype(mxu_dtype),
        w5=_pad2(params["w5"], hid_p, out_p).astype(mxu_dtype),
        b1=_pad2(params["b1"].astype(jnp.float32), 1, hid_p),
        b2=_pad2(params["b2"].astype(jnp.float32), 1, hid_p),
        b3=_pad2(params["b3"].astype(jnp.float32), 1, hid_p),
        b4=_pad2(params["b4"].astype(jnp.float32), 1, hid_p),
    )
    return wp, out_dim


@functools.partial(jax.jit, static_argnames=("out_dim", "tile_b"))
def mlp_forward(x, wp, *, out_dim, tile_b=256):
    """x: [B, input_dim] float32. wp: padded/cast params from prepare_params()."""
    B, in_dim = x.shape
    mxu_dtype = wp["w1"].dtype
    w_itemsize = jnp.dtype(mxu_dtype).itemsize

    in_p, hid_p = wp["w1"].shape
    out_p = wp["w5"].shape[1]

    # Row alignment: bf16 packs 2 rows per sublane -> align batch/tiles to 16 rows.
    row_align = 16 if w_itemsize == 2 else SUBLANE

    # Pad batch only to the row-pack multiple; partial last tile handled via cdiv grid.
    b_pad = _round_up(B, row_align)

    # --- VMEM-budget-driven tile sizing (generation aware) -----------------
    def est(tb_):
        w_bytes = (in_p * hid_p + 3 * hid_p * hid_p + hid_p * out_p) * w_itemsize  # 1x (Buffered(1))
        b_bytes = 4 * hid_p * 4
        io_bytes = 2 * tb_ * (in_p * w_itemsize + out_p * 4)   # double-buffered x / out tiles
        h_bytes = 4 * tb_ * hid_p * 4                          # live f32 intermediates
        return w_bytes + b_bytes + io_bytes + h_bytes

    headroom = 8 << 20
    vmem_budget = max(_VMEM_CAP - headroom, 16 << 20)

    tb = min(_round_up(tile_b, row_align), b_pad)
    while tb > row_align and est(tb) > vmem_budget:
        tb = max(row_align, _round_up(tb // 2, row_align))

    vmem_limit = int(min(vmem_budget, est(tb) + (4 << 20)))

    grid = (pl.cdiv(b_pad, tb),)
    # Megacore batch sharding only pays off with enough tiles; otherwise it just
    # duplicates the resident weights per TensorCore (v7x) for no overlap benefit.
    dim_sem = ("parallel",) if grid[0] >= 4 else ("arbitrary",)

    # Stream x in the MXU dtype (halves activation DMA for bf16). Feature padding is
    # exact zeros; padded weight rows/cols are zero and tanh_log(0) == 0.
    x_p = _pad2(x, b_pad, in_p).astype(mxu_dtype)

    tile_map = lambda i: (i, 0)          # batch-tiled arrays
    in_specs = [
        pl.BlockSpec((tb, in_p), tile_map),
        _const_spec((in_p, hid_p)),
        _const_spec((1, hid_p)),
        _const_spec((hid_p, hid_p)),
        _const_spec((1, hid_p)),
        _const_spec((hid_p, hid_p)),
        _const_spec((1, hid_p)),
        _const_spec((hid_p, hid_p)),
        _const_spec((1, hid_p)),
        _const_spec((hid_p, out_p)),
    ]
    out_specs = pl.BlockSpec((tb, out_p), tile_map)

    flops = 2 * b_pad * (in_p * hid_p + 3 * hid_p * hid_p + hid_p * out_p)
    transcendentals = 2 * 4 * b_pad * hid_p          # tanh + log1p per hidden element
    w_hbm = (in_p * hid_p + 3 * hid_p * hid_p + hid_p * out_p) * w_itemsize + 4 * hid_p * 4
    bytes_accessed = b_pad * in_p * w_itemsize + w_hbm + b_pad * out_p * 4

    out = pl.pallas_call(
        _make_kernel(mxu_dtype),
        out_shape=jax.ShapeDtypeStruct((b_pad, out_p), jnp.float32),
        grid=grid,
        in_specs=in_specs,
        out_specs=out_specs,
        compiler_params=pltpu.CompilerParams(
            dimension_semantics=dim_sem,
            vmem_limit_bytes=vmem_limit),
        cost_estimate=pl.CostEstimate(flops=flops,
                                      transcendentals=transcendentals,
                                      bytes_accessed=bytes_accessed),
    )(x_p, wp["w1"], wp["b1"], wp["w2"], wp["b2"],
      wp["w3"], wp["b3"], wp["w4"], wp["b4"], wp["w5"])

    return out[:B, :out_dim]


# ----------------------------- host-side setup -----------------------------

def orthogonal_init(key, out_dim, in_dim, dtype=jnp.float32):
    """Deterministic orthogonal init (mimics torch.nn.init.orthogonal_).
    Returns a [out_dim, in_dim] matrix with orthonormal rows or columns."""
    n, m = out_dim, in_dim
    transpose = n < m
    a = jax.random.normal(key, (max(n, m), min(n, m)), dtype=jnp.float32)
    q, r = jnp.linalg.qr(a)
    q = q * jnp.sign(jnp.diag(r))[None, :]
    w = q.T if transpose else q
    return w[:out_dim, :in_dim].astype(dtype)


def make_params(key, input_dim, hidden_dim, output_dim):
    ks = jax.random.split(key, 5)
    # PyTorch weights are [out, in]; store transposed ([in, out]) for x @ W layout.
    w1 = orthogonal_init(ks[0], hidden_dim, input_dim).T
    w2 = orthogonal_init(ks[1], hidden_dim, hidden_dim).T
    w3 = orthogonal_init(ks[2], hidden_dim, hidden_dim).T
    w4 = orthogonal_init(ks[3], hidden_dim, hidden_dim).T
    w5 = orthogonal_init(ks[4], output_dim, hidden_dim).T
    # Biases chosen deterministically zero (nn.Linear default is uniform; values are
    # synthetic — shapes/semantics are what matter). Kept as [1, H] for 2D broadcast.
    zeros = lambda: jnp.zeros((1, hidden_dim), jnp.float32)
    return dict(w1=w1, b1=zeros(), w2=w2, b2=zeros(),
                w3=w3, b3=zeros(), w4=w4, b4=zeros(), w5=w5)


def mlp_reference(x, p):
    def tl(z):
        t = jnp.tanh(z)
        return t * jnp.log1p(t * z)
    h = tl(x @ p["w1"] + p["b1"])
    h = tl(h @ p["w2"] + p["b2"])
    h = tl(h @ p["w3"] + p["b3"])
    h = tl(h @ p["w4"] + p["b4"])
    return h @ p["w5"]


if __name__ == "__main__":
    input_dim, hidden_dim, output_dim = 4, 32, 2
    batch = 8

    key = jax.random.PRNGKey(0)
    k_params, k_x = jax.random.split(key)
    params = make_params(k_params, input_dim, hidden_dim, output_dim)
    x = jax.random.normal(k_x, (batch, input_dim), dtype=jnp.float32)

    ref = mlp_reference(x, params)

    # f32 MXU path: bit-tight check against the reference (debug/validation path).
    wp_f32, out_dim = prepare_params(params, mxu_dtype=jnp.float32)
    out_f32 = jax.block_until_ready(mlp_forward(x, wp_f32, out_dim=out_dim))
    assert out_f32.shape == (batch, output_dim)
    assert jnp.allclose(out_f32, ref, atol=1e-5, rtol=1e-5), "f32 kernel mismatch"

    # bf16-at-the-MXU path (f32 accumulation / element-wise): production default.
    wp_bf16, _ = prepare_params(params, mxu_dtype=jnp.bfloat16)
    out_bf16 = jax.block_until_ready(mlp_forward(x, wp_bf16, out_dim=out_dim))
    assert out_bf16.shape == (batch, output_dim)
    assert jnp.allclose(out_bf16, ref, atol=5e-2, rtol=5e-2), "bf16 kernel mismatch"

    print("KERNEL_OK")
</pallas_src>

<mosaic_0001>
module attributes {stable_mosaic.version = 11 : i64} {
  func.func @kernel(%arg0: i32, %arg1: memref<8x128xf32, #tpu.memory_space<vmem>>, %arg2: memref<128x128xf32, #tpu.memory_space<vmem>>, %arg3: memref<1x128xf32, #tpu.memory_space<vmem>>, %arg4: memref<128x128xf32, #tpu.memory_space<vmem>>, %arg5: memref<1x128xf32, #tpu.memory_space<vmem>>, %arg6: memref<128x128xf32, #tpu.memory_space<vmem>>, %arg7: memref<1x128xf32, #tpu.memory_space<vmem>>, %arg8: memref<128x128xf32, #tpu.memory_space<vmem>>, %arg9: memref<1x128xf32, #tpu.memory_space<vmem>>, %arg10: memref<128x128xf32, #tpu.memory_space<vmem>>, %arg11: memref<8x128xf32, #tpu.memory_space<vmem>>) attributes {dimension_semantics = [#tpu.dimension_semantics<arbitrary>], iteration_bounds = array<i64: 1>, scalar_prefetch = 0 : i64, scratch_operands = 0 : i64, tpu.core_type = #tpu.core_type<tc>, window_params = [{transform_indices = @transform_0, window_bounds = array<i64: 8, 128>}, {pipeline_mode = #tpu.pipeline_mode<synchronous>, transform_indices = @transform_1, window_bounds = array<i64: 128, 128>}, {pipeline_mode = #tpu.pipeline_mode<synchronous>, transform_indices = @transform_2, window_bounds = array<i64: 1, 128>}, {pipeline_mode = #tpu.pipeline_mode<synchronous>, transform_indices = @transform_3, window_bounds = array<i64: 128, 128>}, {pipeline_mode = #tpu.pipeline_mode<synchronous>, transform_indices = @transform_4, window_bounds = array<i64: 1, 128>}, {pipeline_mode = #tpu.pipeline_mode<synchronous>, transform_indices = @transform_5, window_bounds = array<i64: 128, 128>}, {pipeline_mode = #tpu.pipeline_mode<synchronous>, transform_indices = @transform_6, window_bounds = array<i64: 1, 128>}, {pipeline_mode = #tpu.pipeline_mode<synchronous>, transform_indices = @transform_7, window_bounds = array<i64: 128, 128>}, {pipeline_mode = #tpu.pipeline_mode<synchronous>, transform_indices = @transform_8, window_bounds = array<i64: 1, 128>}, {pipeline_mode = #tpu.pipeline_mode<synchronous>, transform_indices = @transform_9, window_bounds = array<i64: 128, 128>}, {transform_indices = @transform_10, window_bounds = array<i64: 8, 128>}]} {
    %c0 = arith.constant 0 : index
    %c0_0 = arith.constant 0 : index
    %0 = vector.load %arg1[%c0, %c0_0] : memref<8x128xf32, #tpu.memory_space<vmem>>, vector<8x128xf32>
    %c0_1 = arith.constant 0 : index
    %c0_2 = arith.constant 0 : index
    %1 = vector.load %arg2[%c0_1, %c0_2] : memref<128x128xf32, #tpu.memory_space<vmem>>, vector<128x128xf32>
    %cst = arith.constant dense<0.000000e+00> : vector<8x128xf32>
    %2 = tpu.matmul %0, %1, %cst {dimension_numbers = #tpu.dot_dimension_numbers<[1], [0], [0], [1], [0, 0, 1, 1], [], []>} : vector<8x128xf32>, vector<128x128xf32>, vector<8x128xf32> -> vector<8x128xf32>
    %c0_3 = arith.constant 0 : index
    %c0_4 = arith.constant 0 : index
    %3 = vector.load %arg3[%c0_3, %c0_4] : memref<1x128xf32, #tpu.memory_space<vmem>>, vector<1x128xf32>
    %4 = vector.broadcast %3 : vector<1x128xf32> to vector<8x128xf32>
    %5 = arith.addf %2, %4 : vector<8x128xf32>
    %6 = math.tanh %5 : vector<8x128xf32>
    %7 = arith.mulf %6, %5 : vector<8x128xf32>
    %8 = math.log1p %7 : vector<8x128xf32>
    %9 = arith.mulf %6, %8 : vector<8x128xf32>
    %c0_5 = arith.constant 0 : index
    %c0_6 = arith.constant 0 : index
    %10 = vector.load %arg4[%c0_5, %c0_6] : memref<128x128xf32, #tpu.memory_space<vmem>>, vector<128x128xf32>
    %cst_7 = arith.constant dense<0.000000e+00> : vector<8x128xf32>
    %11 = tpu.matmul %9, %10, %cst_7 {dimension_numbers = #tpu.dot_dimension_numbers<[1], [0], [0], [1], [0, 0, 1, 1], [], []>} : vector<8x128xf32>, vector<128x128xf32>, vector<8x128xf32> -> vector<8x128xf32>
    %c0_8 = arith.constant 0 : index
    %c0_9 = arith.constant 0 : index
    %12 = vector.load %arg5[%c0_8, %c0_9] : memref<1x128xf32, #tpu.memory_space<vmem>>, vector<1x128xf32>
    %13 = vector.broadcast %12 : vector<1x128xf32> to vector<8x128xf32>
    %14 = arith.addf %11, %13 : vector<8x128xf32>
    %15 = math.tanh %14 : vector<8x128xf32>
    %16 = arith.mulf %15, %14 : vector<8x128xf32>
    %17 = math.log1p %16 : vector<8x128xf32>
    %18 = arith.mulf %15, %17 : vector<8x128xf32>
    %c0_10 = arith.constant 0 : index
    %c0_11 = arith.constant 0 : index
    %19 = vector.load %arg6[%c0_10, %c0_11] : memref<128x128xf32, #tpu.memory_space<vmem>>, vector<128x128xf32>
    %cst_12 = arith.constant dense<0.000000e+00> : vector<8x128xf32>
    %20 = tpu.matmul %18, %19, %cst_12 {dimension_numbers = #tpu.dot_dimension_numbers<[1], [0], [0], [1], [0, 0, 1, 1], [], []>} : vector<8x128xf32>, vector<128x128xf32>, vector<8x128xf32> -> vector<8x128xf32>
    %c0_13 = arith.constant 0 : index
    %c0_14 = arith.constant 0 : index
    %21 = vector.load %arg7[%c0_13, %c0_14] : memref<1x128xf32, #tpu.memory_space<vmem>>, vector<1x128xf32>
    %22 = vector.broadcast %21 : vector<1x128xf32> to vector<8x128xf32>
    %23 = arith.addf %20, %22 : vector<8x128xf32>
    %24 = math.tanh %23 : vector<8x128xf32>
    %25 = arith.mulf %24, %23 : vector<8x128xf32>
    %26 = math.log1p %25 : vector<8x128xf32>
    %27 = arith.mulf %24, %26 : vector<8x128xf32>
    %c0_15 = arith.constant 0 : index
    %c0_16 = arith.constant 0 : index
    %28 = vector.load %arg8[%c0_15, %c0_16] : memref<128x128xf32, #tpu.memory_space<vmem>>, vector<128x128xf32>
    %cst_17 = arith.constant dense<0.000000e+00> : vector<8x128xf32>
    %29 = tpu.matmul %27, %28, %cst_17 {dimension_numbers = #tpu.dot_dimension_numbers<[1], [0], [0], [1], [0, 0, 1, 1], [], []>} : vector<8x128xf32>, vector<128x128xf32>, vector<8x128xf32> -> vector<8x128xf32>
    %c0_18 = arith.constant 0 : index
    %c0_19 = arith.constant 0 : index
    %30 = vector.load %arg9[%c0_18, %c0_19] : memref<1x128xf32, #tpu.memory_space<vmem>>, vector<1x128xf32>
    %31 = vector.broadcast %30 : vector<1x128xf32> to vector<8x128xf32>
    %32 = arith.addf %29, %31 : vector<8x128xf32>
    %33 = math.tanh %32 : vector<8x128xf32>
    %34 = arith.mulf %33, %32 : vector<8x128xf32>
    %35 = math.log1p %34 : vector<8x128xf32>
    %36 = arith.mulf %33, %35 : vector<8x128xf32>
    %c0_20 = arith.constant 0 : index
    %c0_21 = arith.constant 0 : index
    %37 = vector.load %arg10[%c0_20, %c0_21] : memref<128x128xf32, #tpu.memory_space<vmem>>, vector<128x128xf32>
    %cst_22 = arith.constant dense<0.000000e+00> : vector<8x128xf32>
    %38 = tpu.matmul %36, %37, %cst_22 {dimension_numbers = #tpu.dot_dimension_numbers<[1], [0], [0], [1], [0, 0, 1, 1], [], []>} : vector<8x128xf32>, vector<128x128xf32>, vector<8x128xf32> -> vector<8x128xf32>
    %c0_23 = arith.constant 0 : index
    %c0_24 = arith.constant 0 : index
    %39 = vector.load %arg11[%c0_23, %c0_24] : memref<8x128xf32, #tpu.memory_space<vmem>>, vector<8x128xf32>
    tpu.vector_store %arg11[%c0_23, %c0_24], %38 {strides = array<i32>} : memref<8x128xf32, #tpu.memory_space<vmem>>, vector<8x128xf32>,
    return
  }
  func.func @transform_0(%arg0: i32) -> (i32, i32) {
    %c0_i32 = arith.constant 0 : i32
    %c0_i32_0 = arith.constant 0 : i32
    return %arg0, %c0_i32 : i32, i32
  }
  func.func @transform_1(%arg0: i32) -> (i32, i32) {
    %c0_i32 = arith.constant 0 : i32
    %c0_i32_0 = arith.constant 0 : i32
    %c0_i32_1 = arith.constant 0 : i32
    return %c0_i32, %c0_i32_0 : i32, i32
  }
  func.func @transform_2(%arg0: i32) -> (i32, i32) {
    %c0_i32 = arith.constant 0 : i32
    %c0_i32_0 = arith.constant 0 : i32
    %c0_i32_1 = arith.constant 0 : i32
    return %c0_i32, %c0_i32_0 : i32, i32
  }
  func.func @transform_3(%arg0: i32) -> (i32, i32) {
    %c0_i32 = arith.constant 0 : i32
    %c0_i32_0 = arith.constant 0 : i32
    %c0_i32_1 = arith.constant 0 : i32
    return %c0_i32, %c0_i32_0 : i32, i32
  }
  func.func @transform_4(%arg0: i32) -> (i32, i32) {
    %c0_i32 = arith.constant 0 : i32
    %c0_i32_0 = arith.constant 0 : i32
    %c0_i32_1 = arith.constant 0 : i32
    return %c0_i32, %c0_i32_0 : i32, i32
  }
  func.func @transform_5(%arg0: i32) -> (i32, i32) {
    %c0_i32 = arith.constant 0 : i32
    %c0_i32_0 = arith.constant 0 : i32
    %c0_i32_1 = arith.constant 0 : i32
    return %c0_i32, %c0_i32_0 : i32, i32
  }
  func.func @transform_6(%arg0: i32) -> (i32, i32) {
    %c0_i32 = arith.constant 0 : i32
    %c0_i32_0 = arith.constant 0 : i32
    %c0_i32_1 = arith.constant 0 : i32
    return %c0_i32, %c0_i32_0 : i32, i32
  }
  func.func @transform_7(%arg0: i32) -> (i32, i32) {
    %c0_i32 = arith.constant 0 : i32
    %c0_i32_0 = arith.constant 0 : i32
    %c0_i32_1 = arith.constant 0 : i32
    return %c0_i32, %c0_i32_0 : i32, i32
  }
  func.func @transform_8(%arg0: i32) -> (i32, i32) {
    %c0_i32 = arith.constant 0 : i32
    %c0_i32_0 = arith.constant 0 : i32
    %c0_i32_1 = arith.constant 0 : i32
    return %c0_i32, %c0_i32_0 : i32, i32
  }
  func.func @transform_9(%arg0: i32) -> (i32, i32) {
    %c0_i32 = arith.constant 0 : i32
    %c0_i32_0 = arith.constant 0 : i32
    %c0_i32_1 = arith.constant 0 : i32
    return %c0_i32, %c0_i32_0 : i32, i32
  }
  func.func @transform_10(%arg0: i32) -> (i32, i32) {
    %c0_i32 = arith.constant 0 : i32
    %c0_i32_0 = arith.constant 0 : i32
    return %arg0, %c0_i32 : i32, i32
  }
}

</mosaic_0001>

<bundles_post_ra>
// kernel: mlp_forward.1
= control target key start
LH: loop header
LB: loop body
LE: loop exit
PB: predicated region body
PF: predicated region fallthrough
CT: control target
= control target key end

     0   :  { %15 = vsyncpa [#allocation3], 0  ;;  %s1366_s0 = inlined_call_operand.vmem [shape: f32[8,128], index: 0, kind: input, shape index: {}]   ;;  %s1367_s1 = inlined_call_operand.hbm [shape: f32[128,128], index: 1, kind: input, shape index: {}]   ;;  %s1368_s2 = inlined_call_operand.vmem [shape: f32[1,128], index: 2, kind: input, shape index: {}]   ;;  %s1369_s3 = inlined_call_operand.hbm [shape: f32[128,128], index: 3, kind: input, shape index: {}]   ;;  %s1370_s4 = inlined_call_operand.vmem [shape: f32[1,128], index: 4, kind: input, shape index: {}]   ;;  %s1371_s5 = inlined_call_operand.hbm [shape: f32[128,128], index: 5, kind: input, shape index: {}]   ;;  %s1372_s6 = inlined_call_operand.vmem [shape: f32[1,128], index: 6, kind: input, shape index: {}]   ;;  %s1373_s7 = inlined_call_operand.hbm [shape: f32[128,128], index: 7, kind: input, shape index: {}]   ;;  %s1374_s8 = inlined_call_operand.vmem [shape: f32[1,128], index: 8, kind: input, shape index: {}]   ;;  %s1375_s9 = inlined_call_operand.hbm [shape: f32[128,128], index: 9, kind: input, shape index: {}]   ;;  %s1376_s10 = inlined_call_operand.vmem [shape: f32[8,128], index: 10, kind: output, shape index: {}]  }
   0x1   :  { %16 = vsyncpa [#allocation5], 0 }
   0x2   :  { %17 = vsyncpa [#allocation8], 0  ;;  %s1144_s13 = smov [#allocation4]   ;;  %s1145_s15 = smov [#allocation7]  }
   0x3   :  { %s39_s14 = sshll.u32 %s1144_s13, 4  ;;  %s67_s16 = sshll.u32 %s1145_s15, 4  ;;  %s40_s14 = int_to_ptr.vmem [resolvable:$true] %s39_s14  ;;  %s1209_s16 = int_to_ptr.vmem [resolvable:$true] %s67_s16 }
   0x4   :  { %s1028_s19 = scalar_lea.hbm %s1369_s3, 2048 }
   0x5   :  { %p1029_p0 = scmp.ne.s32.totalorder %s1369_s3, %s1028_s19  ;;  %p1032_p1 = scmp.lt.u32.totalorder %s1028_s19, %s1369_s3 }
   0x7   :  { %p1034_p2 = pnand %p1032_p1, %p1029_p0 }
   0x9   :  { %1037 = shalt.err (!%p1034_p2)
}
   0xa   :  { %s1038_s24 = scalar_lea.vmem %s40_s14, 2048  ;;  %p1043_p4 = scmp.lt.s32.totalorder %s40_s14, %s40_s14 }
   0xb   :  { %p1039_p3 = scmp.ne.s32.totalorder %s40_s14, %s1038_s24  ;;  %p1044_p5 = scmp.lt.s32.totalorder %s1038_s24, %s1038_s24 }
   0xd   :  { %p1045_p6 = por %p1044_p5, %p1043_p4 }
   0xf   :  { %p1046_p7 = pnand %p1045_p6, %p1039_p3 }
  0x11   :  { %1049 = shalt.err (!%p1046_p7)
}
  0x12   :  { %s1146_s25 = smov 128   ;;  %s1147_s26 = smov 8  }
  0x13   :  { %45 = dma.hbm_to_vmem [thread:$0]  %s1369_s3, 2048, %s40_s14, [#allocation5], %s1146_s25, %s1146_s25, %s1147_s26  }
  0x14   :  { %s1050_s11 = scalar_lea.hbm %s1373_s7, 2048 }
  0x15   :  { %p1051_p8 = scmp.ne.s32.totalorder %s1373_s7, %s1050_s11  ;;  %p1054_p9 = scmp.lt.u32.totalorder %s1050_s11, %s1373_s7 }
  0x17   :  { %p1056_p10 = pnand %p1054_p9, %p1051_p8 }
  0x19   :  { %1059 = shalt.err (!%p1056_p10)
}
  0x1a   :  { %s1060_s18 = scalar_lea.vmem %s1209_s16, 2048  ;;  %p1065_p12 = scmp.lt.s32.totalorder %s1209_s16, %s1209_s16 }
  0x1b   :  { %p1061_p11 = scmp.ne.s32.totalorder %s1209_s16, %s1060_s18  ;;  %p1066_p13 = scmp.lt.s32.totalorder %s1060_s18, %s1060_s18 }
  0x1d   :  { %p1067_p0 = por %p1066_p13, %p1065_p12 }
  0x1f   :  { %p1068_p1 = pnand %p1067_p0, %p1061_p11 }
  0x21   :  { %1071 = shalt.err (!%p1068_p1)
}
  0x22   :  { %73 = dma.hbm_to_vmem [thread:$0]  %s1373_s7, 2048, %s1209_s16, [#allocation8], %s1146_s25, %s1146_s25, %s1147_s26  }
  0x23   :  { %s1148_s19 = smov [#allocation2]   ;;  %s1149_s21 = smov [#allocation6]  }
  0x24   :  { %s25_s20 = sshll.u32 %s1148_s19, 4  ;;  %s53_s22 = sshll.u32 %s1149_s21, 4  ;;  %s26_s20 = int_to_ptr.vmem [resolvable:$true] %s25_s20  ;;  %s1246_s22 = int_to_ptr.vmem [resolvable:$true] %s53_s22 }
  0x25   :  { %s1072_s27 = scalar_lea.hbm %s1367_s1, 2048 }
  0x26   :  { %p1073_p2 = scmp.ne.s32.totalorder %s1367_s1, %s1072_s27  ;;  %p1076_p3 = scmp.lt.u32.totalorder %s1072_s27, %s1367_s1 }
  0x28   :  { %p1078_p4 = pnand %p1076_p3, %p1073_p2 }
  0x2a   :  { %1081 = shalt.err (!%p1078_p4)
}
  0x2b   :  { %s1082_s7 = scalar_lea.vmem %s26_s20, 2048  ;;  %p1087_p6 = scmp.lt.s32.totalorder %s26_s20, %s26_s20 }
  0x2c   :  { %p1083_p5 = scmp.ne.s32.totalorder %s26_s20, %s1082_s7  ;;  %p1088_p7 = scmp.lt.s32.totalorder %s1082_s7, %s1082_s7 }
  0x2e   :  { %p1089_p8 = por %p1088_p7, %p1087_p6 }
  0x30   :  { %p1090_p9 = pnand %p1089_p8, %p1083_p5 }
  0x32   :  { %1093 = shalt.err (!%p1090_p9)
}
  0x33   :  { %31 = dma.hbm_to_vmem [thread:$0]  %s1367_s1, 2048, %s26_s20, [#allocation3], %s1146_s25, %s1146_s25, %s1147_s26  }
  0x34   :  { %s1094_s17 = scalar_lea.hbm %s1371_s5, 2048 }
  0x35   :  { %p1095_p10 = scmp.ne.s32.totalorder %s1371_s5, %s1094_s17  ;;  %p1098_p11 = scmp.lt.u32.totalorder %s1094_s17, %s1371_s5 }
  0x37   :  { %p1100_p12 = pnand %p1098_p11, %p1095_p10 }
  0x39   :  { %1103 = shalt.err (!%p1100_p12)
}
  0x3a   :  { %s1104_s21 = scalar_lea.vmem %s1246_s22, 2048  ;;  %p1109_p0 = scmp.lt.s32.totalorder %s1246_s22, %s1246_s22 }
  0x3b   :  { %p1105_p13 = scmp.ne.s32.totalorder %s1246_s22, %s1104_s21  ;;  %p1110_p1 = scmp.lt.s32.totalorder %s1104_s21, %s1104_s21 }
  0x3d   :  { %p1111_p2 = por %p1110_p1, %p1109_p0 }
  0x3f   :  { %p1112_p3 = pnand %p1111_p2, %p1105_p13 }
  0x41   :  { %1115 = shalt.err (!%p1112_p3)
}
  0x42   :  { %59 = dma.hbm_to_vmem [thread:$0]  %s1371_s5, 2048, %s1246_s22, [#allocation5], %s1146_s25, %s1146_s25, %s1147_s26  }
  0x43   :  { %s1150_s23 = smov [#allocation9]   ;;  %s1116_s29 = scalar_lea.hbm %s1375_s9, 2048 }
  0x44   :  { %s81_s24 = sshll.u32 %s1150_s23, 4  ;;  %p1117_p4 = scmp.ne.s32.totalorder %s1375_s9, %s1116_s29  ;;  %s82_s24 = int_to_ptr.vmem [resolvable:$true] %s81_s24 }
  0x45   :  { %p1120_p5 = scmp.lt.u32.totalorder %s1116_s29, %s1375_s9 }
  0x47   :  { %p1122_p6 = pnand %p1120_p5, %p1117_p4 }
  0x49   :  { %1125 = shalt.err (!%p1122_p6)
}
  0x4a   :  { %s1126_s12 = scalar_lea.vmem %s82_s24, 2048  ;;  %p1131_p8 = scmp.lt.s32.totalorder %s82_s24, %s82_s24 }
  0x4b   :  { %p1127_p7 = scmp.ne.s32.totalorder %s82_s24, %s1126_s12  ;;  %p1132_p9 = scmp.lt.s32.totalorder %s1126_s12, %s1126_s12 }
  0x4d   :  { %p1133_p10 = por %p1132_p9, %p1131_p8 }
  0x4f   :  { %p1134_p11 = pnand %p1133_p10, %p1127_p7 }
  0x51   :  { %1137 = shalt.err (!%p1134_p11)
}
  0x52   :  { %87 = dma.hbm_to_vmem [thread:$0]  %s1375_s9, 2048, %s82_s24, [#allocation8], %s1146_s25, %s1146_s25, %s1147_s26  }
  0x53   :  { %1138 = dma.done.wait [#allocation3], 2048  }
  0x54   :  { %1139 = vsyncadd [#allocation3], 4294965248 }
  0x55   :  { %1140 = dma.done.wait [#allocation5], 4096  }
  0x56   :  { %1141 = vsyncadd [#allocation5], 4294963200 }
  0x57   :  { %1142 = dma.done.wait [#allocation8], 4096  }
  0x58   :  { %1143 = vsyncadd [#allocation8], 4294963200  ;;  %v1151_v0 = vmov 0.0|0.0   ;;  %vm1152_vm0 = vmmov 0   ;;  %v1153_v1 = vmov 0.0   ;;  %v104_v2 = vld [vmem:[#allocation2] sm:$0xff] }
  0x59   :  { %882 = vmatprep.subr.bf16.mxu0 %v1151_v0  ;;  %739 = vmatprep.mubr.msk.f32.mxu0 %vm1152_vm0, %v1153_v1  ;;  %v105_v3 = vld [vmem:[#allocation2 + $0x8] sm:$0xff]  ;;  %v106_v4 = vld [vmem:[#allocation2 + $0x10] sm:$0xff]  ;;  %v107_v6 = vld [vmem:[#allocation2 + $0x18] sm:$0xff] }
  0x5a   :  { %906 = vmatprep.subr.bf16.mxu1 %v1151_v0  ;;  %774 = vmatprep.mubr.msk.f32.mxu1 %vm1152_vm0, %v1153_v1  ;;  %v883_v5 = vpack.c.bf16 %v105_v3, %v104_v2  ;;  %v886_v7 = vpack.c.bf16 %v107_v6, %v106_v4  ;;  %v108_v8 = vld [vmem:[#allocation2 + $0x20] sm:$0xff]  ;;  %v109_v9 = vld [vmem:[#allocation2 + $0x28] sm:$0xff]  ;;  %v110_v11 = vld [vmem:[#allocation2 + $0x30] sm:$0xff] }
  0x5b   :  { %v889_v10 = vpack.c.bf16 %v109_v9, %v108_v8  ;;  %v111_v12 = vld [vmem:[#allocation2 + $0x38] sm:$0xff]  ;;  %v112_v14 = vld [vmem:[#allocation2 + $0x40] sm:$0xff]  ;;  %v113_v15 = vld [vmem:[#allocation2 + $0x48] sm:$0xff] }
  0x5c   :  { %884 = vmatpush3.bf16.msra.mxu0 %v883_v5  ;;  %v892_v13 = vpack.c.bf16 %v111_v12, %v110_v11  ;;  %v895_v16 = vpack.c.bf16 %v113_v15, %v112_v14  ;;  %v114_v17 = vld [vmem:[#allocation2 + $0x50] sm:$0xff]  ;;  %v115_v18 = vld [vmem:[#allocation2 + $0x58] sm:$0xff]  ;;  %v116_v20 = vld [vmem:[#allocation2 + $0x60] sm:$0xff] }
  0x5d   :  { %885 = vmatprep.subr.bf16.mxu0 %v1151_v0  ;;  %v898_v19 = vpack.c.bf16 %v115_v18, %v114_v17  ;;  %v117_v21 = vld [vmem:[#allocation2 + $0x68] sm:$0xff]  ;;  %v118_v23 = vld [vmem:[#allocation2 + $0x70] sm:$0xff]  ;;  %v119_v24 = vld [vmem:[#allocation2 + $0x78] sm:$0xff] }
  0x5e   :  { %v901_v22 = vpack.c.bf16 %v117_v21, %v116_v20  ;;  %v904_v25 = vpack.c.bf16 %v119_v24, %v118_v23  ;;  %v103_v26 = vld [vmem:[%s1366_s0] sm:$0xff]  ;;  %v210_v28 = vld [vmem:[#allocation4 + $0x8] sm:$0xff]  ;;  %v211_v30 = vld [vmem:[#allocation4 + $0x10] sm:$0xff] }
  0x5f   :  { %v209_v27 = vld [vmem:[#allocation4] sm:$0xff]  ;;  %v212_v31 = vld [vmem:[#allocation4 + $0x18] sm:$0xff]  ;;  %v214_v34 = vld [vmem:[#allocation4 + $0x28] sm:$0xff] }
  0x60   :  { %887 = vmatpush3.bf16.msra.mxu0 %v886_v7  ;;  %v907_v29 = vpack.c.bf16 %v210_v28, %v209_v27  ;;  %v910_v32 = vpack.c.bf16 %v212_v31, %v211_v30  ;;  %v213_v33 = vld [vmem:[#allocation4 + $0x20] sm:$0xff]  ;;  %v215_v36 = vld [vmem:[#allocation4 + $0x30] sm:$0xff]  ;;  %v216_v37 = vld [vmem:[#allocation4 + $0x38] sm:$0xff] }
  0x61   :  { %888 = vmatprep.subr.bf16.mxu0 %v1151_v0  ;;  %v913_v35 = vpack.c.bf16 %v214_v34, %v213_v33  ;;  %v916_v38 = vpack.c.bf16 %v216_v37, %v215_v36  ;;  %v217_v39 = vld [vmem:[#allocation4 + $0x40] sm:$0xff]  ;;  %v218_v40 = vld [vmem:[#allocation4 + $0x48] sm:$0xff]  ;;  %v219_v42 = vld [vmem:[#allocation4 + $0x50] sm:$0xff] }
  0x62   :  { %908 = vmatpush3.bf16.msra.mxu1 %v907_v29  ;;  %v919_v41 = vpack.c.bf16 %v218_v40, %v217_v39  ;;  %v220_v43 = vld [vmem:[#allocation4 + $0x58] sm:$0xff]  ;;  %v221_v45 = vld [vmem:[#allocation4 + $0x60] sm:$0xff]  ;;  %v222_v46 = vld [vmem:[#allocation4 + $0x68] sm:$0xff] }
  0x63   :  { %909 = vmatprep.subr.bf16.mxu1 %v1151_v0  ;;  %v922_v44 = vpack.c.bf16 %v220_v43, %v219_v42  ;;  %v925_v47 = vpack.c.bf16 %v222_v46, %v221_v45  ;;  %v223_v48 = vld [vmem:[#allocation4 + $0x70] sm:$0xff]  ;;  %v224_v49 = vld [vmem:[#allocation4 + $0x78] sm:$0xff]  ;;  %v618_v51 = vld [vmem:[%s1368_s2] ss:$0 sm:$0xff] }
  0x64   :  { %890 = vmatpush3.bf16.msra.mxu0 %v889_v10  ;;  %v928_v50 = vpack.c.bf16 %v224_v49, %v223_v48  ;;  %v314_v4 = vld [vmem:[#allocation6] sm:$0xff]  ;;  %v315_v5 = vld [vmem:[#allocation6 + $0x8] sm:$0xff]  ;;  %v316_v7 = vld [vmem:[#allocation6 + $0x10] sm:$0xff] }
  0x65   :  { %891 = vmatprep.subr.bf16.mxu0 %v1151_v0  ;;  %v931_v6 = vpack.c.bf16 %v315_v5, %v314_v4  ;;  %v317_v8 = vld [vmem:[#allocation6 + $0x18] sm:$0xff]  ;;  %v318_v10 = vld [vmem:[#allocation6 + $0x20] sm:$0xff]  ;;  %v319_v11 = vld [vmem:[#allocation6 + $0x28] sm:$0xff] }
  0x66   :  { %911 = vmatpush3.bf16.msra.mxu1 %v910_v32  ;;  %v934_v9 = vpack.c.bf16 %v317_v8, %v316_v7  ;;  %v937_v12 = vpack.c.bf16 %v319_v11, %v318_v10  ;;  %v321_v14 = vld [vmem:[#allocation6 + $0x38] sm:$0xff]  ;;  %v323_v17 = vld [vmem:[#allocation6 + $0x48] sm:$0xff]  ;;  %v326_v21 = vld [vmem:[#allocation6 + $0x60] sm:$0xff] }
  0x67   :  { %912 = vmatprep.subr.bf16.mxu1 %v1151_v0  ;;  %v325_v20 = vld [vmem:[#allocation6 + $0x58] sm:$0xff]  ;;  %v327_v23 = vld [vmem:[#allocation6 + $0x68] sm:$0xff]  ;;  %v619_v28 = vld [vmem:[%s1370_s4] ss:$0 sm:$0xff] }
  0x68   :  { %893 = vmatpush3.bf16.msra.mxu0 %v892_v13  ;;  %v320_v13 = vld [vmem:[#allocation6 + $0x30] sm:$0xff]  ;;  %v949_v24 = vpack.c.bf16 %v327_v23, %v326_v21  ;;  %v419_v43 = vld [vmem:[#allocation7] sm:$0xff]  ;;  %v527_v23 = vld [vmem:[#allocation9 + $0x18] sm:$0xff] }
  0x69   :  { %894 = vmatprep.subr.bf16.mxu0 %v1151_v0  ;;  %v940_v15 = vpack.c.bf16 %v321_v14, %v320_v13  ;;  %v421_v46 = vld [vmem:[#allocation7 + $0x10] sm:$0xff]  ;;  %v423_v49 = vld [vmem:[#allocation7 + $0x20] sm:$0xff] }
  0x6a   :  { %914 = vmatpush3.bf16.msra.mxu1 %v913_v35  ;;  %v620_v4 = vld [vmem:[%s1372_s6] ss:$0 sm:$0xff] }
  0x6b   :  { %915 = vmatprep.subr.bf16.mxu1 %v1151_v0 }
  0x6c   :  { %896 = vmatpush3.bf16.msra.mxu0 %v895_v16  ;;  %v322_v16 = vld [vmem:[#allocation6 + $0x40] sm:$0xff] }
  0x6d   :  { %897 = vmatprep.subr.bf16.mxu0 %v1151_v0  ;;  %v943_v18 = vpack.c.bf16 %v323_v17, %v322_v16 }
  0x6e   :  { %917 = vmatpush3.bf16.msra.mxu1 %v916_v38 }
  0x6f   :  { %918 = vmatprep.subr.bf16.mxu1 %v1151_v0 }
  0x70   :  { %899 = vmatpush3.bf16.msra.mxu0 %v898_v19  ;;  %v324_v19 = vld [vmem:[#allocation6 + $0x50] sm:$0xff] }
  0x71   :  { %900 = vmatprep.subr.bf16.mxu0 %v1151_v0 }
  0x72   :  { %920 = vmatpush3.bf16.msra.mxu1 %v919_v41 }
  0x73   :  { %921 = vmatprep.subr.bf16.mxu1 %v1151_v0 }
  0x74   :  { %902 = vmatpush3.bf16.msra.mxu0 %v901_v22  ;;  %v946_v22 = vpack.c.bf16 %v325_v20, %v324_v19  ;;  %v524_v19 = vld [vmem:[#allocation9] sm:$0xff]  ;;  %v525_v20 = vld [vmem:[#allocation9 + $0x8] sm:$0xff] }
  0x75   :  { %903 = vmatprep.subr.bf16.mxu0 %v1151_v0  ;;  %v979_v21 = vpack.c.bf16 %v525_v20, %v524_v19 }
  0x76   :  { %923 = vmatpush3.bf16.msra.mxu1 %v922_v44  ;;  %v420_v44 = vld [vmem:[#allocation7 + $0x8] sm:$0xff] }
  0x77   :  { %924 = vmatprep.subr.bf16.mxu1 %v1151_v0  ;;  %v955_v45 = vpack.c.bf16 %v420_v44, %v419_v43  ;;  %v621_v43 = vld [vmem:[%s1374_s8] ss:$0 sm:$0xff] }
  0x78   :  { %905 = vmatpush3.bf16.msra.mxu0 %v904_v25  ;;  %v328_v25 = vld [vmem:[#allocation6 + $0x70] sm:$0xff] }
  0x79   :  { %930 = vmatprep.subr.bf16.mxu0 %v1151_v0 }
  0x7a   :  { %926 = vmatpush3.bf16.msra.mxu1 %v925_v47  ;;  %v422_v47 = vld [vmem:[#allocation7 + $0x18] sm:$0xff] }
  0x7b   :  { %740 = vmatmul.mubr.f32.vlgmr.msra.gmra.mrb[0].mxu0 %v103_v26  ;;  %927 = vmatprep.subr.bf16.mxu1 %v1151_v0  ;;  %v329_v26 = vld [vmem:[#allocation6 + $0x78] sm:$0xff]  ;;  %v958_v48 = vpack.c.bf16 %v422_v47, %v421_v46 }
  0x7c   :  { %809 = vmatprep.mubr.msk.f32.mxu0 %vm1152_vm0, %v1153_v1  ;;  %932 = vmatpush3.bf16.msra.mxu0 %v931_v6  ;;  %v952_v27 = vpack.c.bf16 %v329_v26, %v328_v25  ;;  %v528_v25 = vld [vmem:[#allocation9 + $0x20] sm:$0xff]  ;;  %v529_v26 = vld [vmem:[#allocation9 + $0x28] sm:$0xff] }
  0x7d   :  { %933 = vmatprep.subr.bf16.mxu0 %v1151_v0 }
  0x7e   :  { %929 = vmatpush3.bf16.msra.mxu1 %v928_v50  ;;  %v424_v50 = vld [vmem:[#allocation7 + $0x28] sm:$0xff] }
  0x7f   :  { %954 = vmatprep.subr.bf16.mxu1 %v1151_v0 }
  0x80   :  { %935 = vmatpush3.bf16.msra.mxu0 %v934_v9 }
  0x81   :  { %936 = vmatprep.subr.bf16.mxu0 %v1151_v0 }
  0x84   :  { %938 = vmatpush3.bf16.msra.mxu0 %v937_v12 }
  0x85   :  { %939 = vmatprep.subr.bf16.mxu0 %v1151_v0 }
  0x88   :  { %941 = vmatpush3.bf16.msra.mxu0 %v940_v15 }
  0x89   :  { %942 = vmatprep.subr.bf16.mxu0 %v1151_v0 }
  0x8c   :  { %944 = vmatpush3.bf16.msra.mxu0 %v943_v18 }
  0x8d   :  { %945 = vmatprep.subr.bf16.mxu0 %v1151_v0 }
  0x90   :  { %947 = vmatpush3.bf16.msra.mxu0 %v946_v22  ;;  %v526_v22 = vld [vmem:[#allocation9 + $0x10] sm:$0xff] }
  0x91   :  { %948 = vmatprep.subr.bf16.mxu0 %v1151_v0 }
  0x94   :  { %950 = vmatpush3.bf16.msra.mxu0 %v949_v24  ;;  %v982_v24 = vpack.c.bf16 %v527_v23, %v526_v22 }
  0x95   :  { %951 = vmatprep.subr.bf16.mxu0 %v1151_v0 }
  0x98   :  { %953 = vmatpush3.bf16.msra.mxu0 %v952_v27  ;;  %v985_v27 = vpack.c.bf16 %v529_v26, %v528_v25 }
  0x99   :  { %978 = vmatprep.subr.bf16.mxu0 %v1151_v0 }
 0x14e   :  { %v193_v52 = vpop.f32.mrb[0].mxu0 }
 0x14f   :  { %v194_v53 = vadd.f32 %v618_v51, %v193_v52  ;;  %v741_v54 = vpop.f32.mrb[1].mxu0  ;;  %v961_v51 = vpack.c.bf16 %v424_v50, %v423_v49  ;;  %v425_v52 = vld [vmem:[#allocation7 + $0x30] sm:$0xff] }
 0x150   :  { %v427_v54 = vld [vmem:[#allocation7 + $0x40] sm:$0xff] }
 0x151   :  { %1012 = vtanh.f32 %v194_v53 }
 0x15b   :  { %v1013_v55 = vpop.eup %1012 }
 0x15c   :  { %v198_v56 = vmul.f32 %v1013_v55, %v194_v53 }
 0x15e   :  { %v199_v57 = vadd.f32 1.0, %v198_v56  ;;  %v202_v58 = vmul.f32 -0.5, %v198_v56  ;;  %v205_v60 = vand.u32 2147483647, %v198_v56 }
 0x160   :  { %1014 = vlog2.f32 %v199_v57  ;;  %v203_v59 = vadd.f32 1.0, %v202_v58  ;;  %vm206_vm1 = vcmp.lt.f32.partialorder %v205_v60, 0.0004427343  ;;  %v429_v57 = vld [vmem:[#allocation7 + $0x50] sm:$0xff]  ;;  %v430_v58 = vld [vmem:[#allocation7 + $0x58] sm:$0xff] }
 0x161   :  { %v970_v60 = vpack.c.bf16 %v430_v58, %v429_v57 }
 0x162   :  { %v204_v63 = vmul.f32 %v203_v59, %v198_v56  ;;  %v431_v59 = vld [vmem:[#allocation7 + $0x60] sm:$0xff] }
 0x16a   :  { %v1015_v61 = vpop.eup %1014 }
 0x16b   :  { %v201_v62 = vmul.f32 0.6931472, %v1015_v61  ;;  %v432_v61 = vld [vmem:[#allocation7 + $0x68] sm:$0xff] }
 0x16d   :  { %v207_v2 = vsel %vm206_vm1, %v204_v63, %v201_v62  ;;  %v973_v62 = vpack.c.bf16 %v432_v61, %v431_v59  ;;  %v433_v63 = vld [vmem:[#allocation7 + $0x70] sm:$0xff] }
 0x16e   :  { %v208_v3 = vmul.f32 %v1013_v55, %v207_v2  ;;  %v428_v55 = vld [vmem:[#allocation7 + $0x48] sm:$0xff]  ;;  %v434_v2 = vld [vmem:[#allocation7 + $0x78] sm:$0xff] }
 0x16f   :  { %v967_v56 = vpack.c.bf16 %v428_v55, %v427_v54 }
 0x170   :  { %775 = vmatmul.mubr.f32.vlgmr.msra.gmra.mrb[0].mxu1 %v208_v3  ;;  %v976_v3 = vpack.c.bf16 %v434_v2, %v433_v63 }
 0x171   :  { %844 = vmatprep.mubr.msk.f32.mxu1 %vm1152_vm0, %v1153_v1  ;;  %956 = vmatpush3.bf16.msra.mxu1 %v955_v45 }
 0x172   :  { %957 = vmatprep.subr.bf16.mxu1 %v1151_v0 }
 0x175   :  { %959 = vmatpush3.bf16.msra.mxu1 %v958_v48 }
 0x176   :  { %960 = vmatprep.subr.bf16.mxu1 %v1151_v0 }
 0x179   :  { %962 = vmatpush3.bf16.msra.mxu1 %v961_v51 }
 0x17a   :  { %963 = vmatprep.subr.bf16.mxu1 %v1151_v0 }
 0x243   :  { %v298_v29 = vpop.f32.mrb[0].mxu1 }
 0x244   :  { %v299_v30 = vadd.f32 %v619_v28, %v298_v29  ;;  %v776_v31 = vpop.f32.mrb[1].mxu1  ;;  %v530_v28 = vld [vmem:[#allocation9 + $0x30] sm:$0xff]  ;;  %v531_v29 = vld [vmem:[#allocation9 + $0x38] sm:$0xff] }
 0x245   :  { %v532_v31 = vld [vmem:[#allocation9 + $0x40] sm:$0xff] }
 0x246   :  { %1016 = vtanh.f32 %v299_v30 }
 0x250   :  { %v1017_v32 = vpop.eup %1016 }
 0x251   :  { %v303_v33 = vmul.f32 %v1017_v32, %v299_v30  ;;  %v988_v30 = vpack.c.bf16 %v531_v29, %v530_v28 }
 0x253   :  { %v304_v34 = vadd.f32 1.0, %v303_v33  ;;  %v307_v35 = vmul.f32 -0.5, %v303_v33  ;;  %v310_v37 = vand.u32 2147483647, %v303_v33 }
 0x255   :  { %1018 = vlog2.f32 %v304_v34  ;;  %v308_v36 = vadd.f32 1.0, %v307_v35  ;;  %vm311_vm2 = vcmp.lt.f32.partialorder %v310_v37, 0.0004427343  ;;  %v534_v34 = vld [vmem:[#allocation9 + $0x50] sm:$0xff]  ;;  %v535_v35 = vld [vmem:[#allocation9 + $0x58] sm:$0xff] }
 0x256   :  { %v994_v37 = vpack.c.bf16 %v535_v35, %v534_v34 }
 0x257   :  { %v309_v39 = vmul.f32 %v308_v36, %v303_v33  ;;  %v536_v36 = vld [vmem:[#allocation9 + $0x60] sm:$0xff] }
 0x25f   :  { %v1019_v38 = vpop.eup %1018 }
 0x260   :  { %v306_v40 = vmul.f32 0.6931472, %v1019_v38  ;;  %v537_v38 = vld [vmem:[#allocation9 + $0x68] sm:$0xff] }
 0x262   :  { %v312_v41 = vsel %vm311_vm2, %v309_v39, %v306_v40  ;;  %v997_v39 = vpack.c.bf16 %v537_v38, %v536_v36  ;;  %v538_v40 = vld [vmem:[#allocation9 + $0x70] sm:$0xff] }
 0x263   :  { %v313_v42 = vmul.f32 %v1017_v32, %v312_v41  ;;  %v533_v32 = vld [vmem:[#allocation9 + $0x48] sm:$0xff]  ;;  %v539_v41 = vld [vmem:[#allocation9 + $0x78] sm:$0xff] }
 0x264   :  { %v991_v33 = vpack.c.bf16 %v533_v32, %v532_v31 }
 0x265   :  { %810 = vmatmul.mubr.f32.vlgmr.msra.gmra.mrb[2].mxu0 %v313_v42  ;;  %v1000_v42 = vpack.c.bf16 %v539_v41, %v538_v40 }
 0x266   :  { %879 = vmatprep.mubr.msk.f32.mxu0 %vm1152_vm0, %v1153_v1  ;;  %v426_v1 = vld [vmem:[#allocation7 + $0x38] sm:$0xff]  ;;  %980 = vmatpush3.bf16.msra.mxu0 %v979_v21 }
 0x267   :  { %v964_v53 = vpack.c.bf16 %v426_v1, %v425_v52  ;;  %981 = vmatprep.subr.bf16.mxu0 %v1151_v0 }
 0x269   :  { %965 = vmatpush3.bf16.msra.mxu1 %v964_v53 }
 0x26a   :  { %966 = vmatprep.subr.bf16.mxu1 %v1151_v0  ;;  %983 = vmatpush3.bf16.msra.mxu0 %v982_v24 }
 0x26b   :  { %984 = vmatprep.subr.bf16.mxu0 %v1151_v0 }
 0x26d   :  { %968 = vmatpush3.bf16.msra.mxu1 %v967_v56 }
 0x26e   :  { %969 = vmatprep.subr.bf16.mxu1 %v1151_v0  ;;  %986 = vmatpush3.bf16.msra.mxu0 %v985_v27 }
 0x26f   :  { %987 = vmatprep.subr.bf16.mxu0 %v1151_v0 }
 0x271   :  { %971 = vmatpush3.bf16.msra.mxu1 %v970_v60 }
 0x272   :  { %972 = vmatprep.subr.bf16.mxu1 %v1151_v0  ;;  %989 = vmatpush3.bf16.msra.mxu0 %v988_v30 }
 0x273   :  { %990 = vmatprep.subr.bf16.mxu0 %v1151_v0 }
 0x275   :  { %974 = vmatpush3.bf16.msra.mxu1 %v973_v62 }
 0x276   :  { %975 = vmatprep.subr.bf16.mxu1 %v1151_v0  ;;  %992 = vmatpush3.bf16.msra.mxu0 %v991_v33 }
 0x277   :  { %993 = vmatprep.subr.bf16.mxu0 %v1151_v0 }
 0x279   :  { %977 = vmatpush3.bf16.msra.mxu1 %v976_v3 }
 0x27a   :  { %995 = vmatpush3.bf16.msra.mxu0 %v994_v37 }
 0x27b   :  { %996 = vmatprep.subr.bf16.mxu0 %v1151_v0 }
 0x27e   :  { %998 = vmatpush3.bf16.msra.mxu0 %v997_v39 }
 0x27f   :  { %999 = vmatprep.subr.bf16.mxu0 %v1151_v0 }
 0x282   :  { %1001 = vmatpush3.bf16.msra.mxu0 %v1000_v42 }
 0x338   :  { %v403_v5 = vpop.f32.mrb[2].mxu0 }
 0x339   :  { %v404_v6 = vadd.f32 %v620_v4, %v403_v5  ;;  %v811_v7 = vpop.f32.mrb[3].mxu0 }
 0x33b   :  { %1020 = vtanh.f32 %v404_v6 }
 0x345   :  { %v1021_v8 = vpop.eup %1020 }
 0x346   :  { %v408_v9 = vmul.f32 %v1021_v8, %v404_v6 }
 0x348   :  { %v409_v10 = vadd.f32 1.0, %v408_v9  ;;  %v412_v11 = vmul.f32 -0.5, %v408_v9  ;;  %v415_v13 = vand.u32 2147483647, %v408_v9 }
 0x34a   :  { %1022 = vlog2.f32 %v409_v10  ;;  %v413_v12 = vadd.f32 1.0, %v412_v11  ;;  %vm416_vm3 = vcmp.lt.f32.partialorder %v415_v13, 0.0004427343 }
 0x34c   :  { %v414_v15 = vmul.f32 %v413_v12, %v408_v9 }
 0x354   :  { %v1023_v14 = vpop.eup %1022 }
 0x355   :  { %v411_v16 = vmul.f32 0.6931472, %v1023_v14 }
 0x357   :  { %v417_v17 = vsel %vm416_vm3, %v414_v15, %v411_v16 }
 0x358   :  { %v418_v18 = vmul.f32 %v1021_v8, %v417_v17 }
 0x35a   :  { %845 = vmatmul.mubr.f32.vlgmr.msra.gmra.mrb[2].mxu1 %v418_v18 }
 0x42d   :  { %v508_v44 = vpop.f32.mrb[2].mxu1 }
 0x42e   :  { %v509_v45 = vadd.f32 %v621_v43, %v508_v44  ;;  %v846_v46 = vpop.f32.mrb[3].mxu1 }
 0x430   :  { %1024 = vtanh.f32 %v509_v45 }
 0x43a   :  { %v1025_v47 = vpop.eup %1024 }
 0x43b   :  { %v513_v48 = vmul.f32 %v1025_v47, %v509_v45 }
 0x43d   :  { %v514_v49 = vadd.f32 1.0, %v513_v48  ;;  %v517_v50 = vmul.f32 -0.5, %v513_v48  ;;  %v520_v52 = vand.u32 2147483647, %v513_v48 }
 0x43f   :  { %1026 = vlog2.f32 %v514_v49  ;;  %v518_v51 = vadd.f32 1.0, %v517_v50  ;;  %vm521_vm4 = vcmp.lt.f32.partialorder %v520_v52, 0.0004427343 }
 0x441   :  { %v519_v53 = vmul.f32 %v518_v51, %v513_v48 }
 0x449   :  { %v1027_v1 = vpop.eup %1026 }
 0x44a   :  { %v516_v54 = vmul.f32 0.6931472, %v1027_v1 }
 0x44c   :  { %v522_v0 = vsel %vm521_vm4, %v519_v53, %v516_v54 }
 0x44d   :  { %v523_v55 = vmul.f32 %v1025_v47, %v522_v0 }
 0x44f   :  { %880 = vmatmul.mubr.f32.vlgmr.msra.gmra.mrb[4].mxu0 %v523_v55 }
 0x522   :  { %v606_v56 = vpop.f32.mrb[4].mxu0 }
 0x523   :  { %610 = vst [vmem:[%s1376_s10] sm:$0xff] %v606_v56  ;;  %v881_v57 = vpop.f32.mrb[5].mxu0 }
 0x524   :  { %615 = vsyncpa [#allocation3], 1 }
 0x525   :  { %616 = vsyncpa [#allocation5], 1 }
 0x526   :  { %617 = vsyncpa [#allocation8], 1 }

</bundles_post_ra>
